<compile_context>
chip_gen: v7x
topology: tpu7x:2x2x1
jax: 0.10.0
libtpu: 0.0.40
codegen_flags: <defaults>
</compile_context>

<pallas_src>
import functools

import jax
import jax.numpy as jnp
from jax.experimental import pallas as pl
from jax.experimental.pallas import tpu as pltpu


_LANE = 128


def _round_up(x, m):
    return ((x + m - 1) // m) * m


def _cdiv(a, b):
    return (a + b - 1) // b


def _sublane(dtype):
    # f32 -> 8, bf16/f16 -> 16, int8/fp8 -> 32
    return max(8, 32 // max(1, jnp.dtype(dtype).itemsize))


@functools.lru_cache(maxsize=None)
def _vmem_budget():
    """Return (per-step in+out block budget, scoped vmem limit) per TPU gen.

    v5e / v6e have 128 MiB physical VMEM -> roomy blocks; v7x (64 MiB) or
    unknown hardware -> conservative.  The pipeline double-buffers each side,
    so actual VMEM use is ~2x the block budget, well inside the limit.
    """
    try:
        get_info = getattr(pltpu, "get_tpu_info", None)
        if get_info is not None:
            cap = getattr(get_info(), "vmem_capacity_bytes", None)
            if cap is not None and cap >= 100 * 1024 * 1024:
                return 16 * 1024 * 1024, 64 * 1024 * 1024
    except Exception:
        pass
    return 8 * 1024 * 1024, 32 * 1024 * 1024


def _kept_lanes(h_out, h, itemsize):
    """Lane extent to read per row in the strided paths.

    Use the 128-aligned kept prefix, unless it covers most of the row
    (>~70%) or would be a sub-KB burst -- short strided bursts waste HBM and
    DMA-descriptor bandwidth, so in those cases read whole rows and let the
    in-kernel slice drop the extra lanes.
    """
    aligned = _round_up(h_out, _LANE)
    if aligned >= h or aligned * itemsize < 1024 or 10 * aligned >= 7 * h:
        return h
    return aligned


def _rows_block(rows, budget_bytes, per_row_bytes, sublane):
    """Block size along a sublane-dim rows axis for a cdiv grid.

    The block must be a sublane multiple or the full extent.  When everything
    fits in one block we still split in two (sublane-aligned) so the
    'parallel' grid axis can shard across v7x's two TensorCores.
    """
    cap = max(1, budget_bytes // max(1, per_row_bytes))
    if rows <= sublane:
        return rows                       # full extent (always legal)
    if rows <= cap:
        half = _round_up(_cdiv(rows, 2), sublane)
        return half if half < rows else rows
    return max(sublane, (cap // sublane) * sublane)


# ---------------------------------------------------------------------------
# Kernels
# ---------------------------------------------------------------------------
def _crop_lastdim_kernel(x_ref, o_ref, *, keep):
    # x_ref: (rows_blk, lane_in); o_ref: (rows_blk, keep) with keep <= lane_in
    o_ref[...] = x_ref[:, :keep]


def _crop3d_kernel(x_ref, o_ref, *, w_keep, h_keep):
    # x_ref: (p_blk, w_blk_in, h_in); o_ref: (p_blk, w_keep, h_keep)
    o_ref[...] = x_ref[:, :w_keep, :h_keep]


def _crop_2d(x2, keep, lane_in, rows_blk, vmem_limit):
    rows = x2.shape[0]
    return pl.pallas_call(
        functools.partial(_crop_lastdim_kernel, keep=keep),
        out_shape=jax.ShapeDtypeStruct((rows, keep), x2.dtype),
        grid_spec=pltpu.PrefetchScalarGridSpec(
            num_scalar_prefetch=0,
            grid=(_cdiv(rows, rows_blk),),
            in_specs=[pl.BlockSpec((rows_blk, lane_in), lambda i: (i, 0))],
            out_specs=pl.BlockSpec((rows_blk, keep), lambda i: (i, 0)),
        ),
        compiler_params=pltpu.CompilerParams(
            dimension_semantics=("parallel",),
            vmem_limit_bytes=vmem_limit,
        ),
    )(x2)


# ---------------------------------------------------------------------------
# Public entry point
# ---------------------------------------------------------------------------
def cut(f_map, out_img_shape):
    """Equivalent of Cut(out_img_shape)(f_map) for an NCHW `f_map`."""
    if f_map.ndim != 4:
        raise ValueError("cut expects a 4-D NCHW tensor")
    n, c, w, h = f_map.shape
    w_out = w - int(out_img_shape[0])
    h_out = h - int(out_img_shape[1])
    if w_out <= 0 or h_out <= 0:
        raise ValueError("crop must leave a non-empty image")

    # Nothing to discard.
    if w_out == w and h_out == h:
        return f_map

    dtype = f_map.dtype
    itemsize = jnp.dtype(dtype).itemsize
    sublane = _sublane(dtype)
    budget, vmem_limit = _vmem_budget()
    p = n * c  # merging leading dims is a free (row-major) reshape

    # ---- Fast path 1: row-only crop (last dim untouched).  The kept region
    # of each plane is a contiguous prefix of the flattened (W*H) axis, so
    # this is one wide lane-dense slice-copy per block of planes.
    if h_out == h:
        full = w * h
        keep = w_out * h
        lane_in = min(full, _round_up(keep, _LANE))
        per_row = (lane_in + keep) * itemsize
        rows_blk = _rows_block(p, budget, per_row, sublane)
        if rows_blk * per_row <= budget:
            x2 = f_map.reshape(p, full)
            y2 = _crop_2d(x2, keep=keep, lane_in=lane_in,
                          rows_blk=rows_blk, vmem_limit=vmem_limit)
            return y2.reshape(n, c, w_out, h)
        # else: huge planes -> fall through to the W-tiled 3-D path below.

    # ---- Fast path 2: column-only crop (W untouched).  Flatten to
    # (N*C*W, H) so the sublane axis is large regardless of N*C; each block's
    # output write is one contiguous run.
    elif w_out == w:
        rows = p * w
        x2 = f_map.reshape(rows, h)
        h_in = _kept_lanes(h_out, h, itemsize)
        per_row = (h_in + h_out) * itemsize
        rows_blk = _rows_block(rows, budget, per_row, sublane)
        y2 = _crop_2d(x2, keep=h_out, lane_in=h_in,
                      rows_blk=rows_blk, vmem_limit=vmem_limit)
        return y2.reshape(n, c, w, h_out)

    # ---- General path: crop both trailing dims (or row-only fallback for
    # huge planes).  Read only the kept W rows (rounded to the sublane
    # alignment) and the kept lane prefix per the contiguity heuristic.
    h_in = _kept_lanes(h_out, h, itemsize)
    w_cap_in = min(w, _round_up(w_out, sublane))
    plane_bytes = (w_cap_in * h_in + w_out * h_out) * itemsize
    force_w_tiling = (p == 1 and w_out >= 2 * sublane)

    x3 = f_map.reshape(p, w, h)

    if plane_bytes <= budget and not force_w_tiling:
        # Whole kept W extent per block; pack as many planes as fit the
        # budget, but keep >=2 grid steps so the 'parallel' axis can shard
        # across v7x's two TensorCores.
        p_blk = min(p, max(1, budget // plane_bytes))
        if p_blk >= p and p >= 2:
            p_blk = _cdiv(p, 2)
        grid = (_cdiv(p, p_blk),)
        in_specs = [pl.BlockSpec((p_blk, w_cap_in, h_in), lambda i: (i, 0, 0))]
        out_specs = pl.BlockSpec((p_blk, w_out, h_out), lambda i: (i, 0, 0))
        w_keep = w_out
        semantics = ("parallel",)
    else:
        # Plane too large for one block (or a single plane): tile W with a
        # sublane-multiple block so the footprint stays bounded even on
        # v7x's 64 MiB VMEM, and the extra grid steps feed both TCs.
        rows_cap = max(1, budget // ((h_in + h_out) * itemsize))
        w_blk = max(sublane, (rows_cap // sublane) * sublane)
        w_blk = min(w_blk, _round_up(w_out, sublane))
        if p == 1:
            w_blk = min(w_blk, max(sublane, _round_up(_cdiv(w_out, 2), sublane)))
        grid = (p, _cdiv(w_out, w_blk))
        in_specs = [pl.BlockSpec((1, w_blk, h_in), lambda i, j: (i, j, 0))]
        out_specs = pl.BlockSpec((1, w_blk, h_out), lambda i, j: (i, j, 0))
        w_keep = w_blk
        semantics = ("parallel", "parallel")

    y3 = pl.pallas_call(
        functools.partial(_crop3d_kernel, w_keep=w_keep, h_keep=h_out),
        out_shape=jax.ShapeDtypeStruct((p, w_out, h_out), dtype),
        grid_spec=pltpu.PrefetchScalarGridSpec(
            num_scalar_prefetch=0,
            grid=grid,
            in_specs=in_specs,
            out_specs=out_specs,
        ),
        compiler_params=pltpu.CompilerParams(
            dimension_semantics=semantics,
            vmem_limit_bytes=vmem_limit,
        ),
    )(x3)
    return y3.reshape(n, c, w_out, h_out)


class Cut:
    """Drop-in functional analogue of the PyTorch Cut module."""

    def __init__(self, out_img_shape):
        self.outs = tuple(int(o) for o in out_img_shape)

    def __call__(self, f_map):
        return cut(f_map, self.outs)


if __name__ == "__main__":
    key = jax.random.PRNGKey(0)
    n, c, w, h = 2, 4, 16, 16
    x = jax.random.normal(key, (n, c, w, h), dtype=jnp.float32)

    # 1) Crop both spatial dims (general 3-D path, >=2 grid steps).
    outs = (2, 3)
    y = jax.block_until_ready(cut(x, outs))
    y_ref = x[..., : w - outs[0], : h - outs[1]]
    assert y.shape == y_ref.shape and y.dtype == x.dtype, y.shape
    assert jnp.array_equal(y, y_ref), "Pallas crop mismatch (general path)"

    # 2) Row-only crop (contiguous prefix -> lane-dense flattened path).
    outs = (5, 0)
    y = jax.block_until_ready(cut(x, outs))
    y_ref = x[..., : w - outs[0], :]
    assert y.shape == y_ref.shape, y.shape
    assert jnp.array_equal(y, y_ref), "Pallas crop mismatch (row-only path)"

    # 3) Column-only crop (flattened N*C*W rows path).
    outs = (0, 6)
    y = jax.block_until_ready(cut(x, outs))
    y_ref = x[..., :, : h - outs[1]]
    assert y.shape == y_ref.shape, y.shape
    assert jnp.array_equal(y, y_ref), "Pallas crop mismatch (column-only path)"

    # 4) Larger plane exercising the partial-read general path and the
    #    two-TensorCore plane split.
    x2 = jax.random.normal(jax.random.PRNGKey(1), (1, 8, 64, 256), jnp.float32)
    outs = (40, 100)
    y2 = jax.block_until_ready(cut(x2, outs))
    y2_ref = x2[..., : 64 - outs[0], : 256 - outs[1]]
    assert y2.shape == y2_ref.shape, y2.shape
    assert jnp.array_equal(y2, y2_ref), "Pallas crop mismatch (partial-read path)"

    print("KERNEL_OK")
</pallas_src>

<mosaic_0001>
module attributes {stable_mosaic.version = 11 : i64} {
  func.func @_crop3d_kernel(%arg0: i32, %arg1: memref<4x16x16xf32, #tpu.memory_space<vmem>>, %arg2: memref<4x14x13xf32, #tpu.memory_space<vmem>>) attributes {dimension_semantics = [#tpu.dimension_semantics<parallel>], iteration_bounds = array<i64: 2>, scalar_prefetch = 0 : i64, scratch_operands = 0 : i64, tpu.core_type = #tpu.core_type<tc>, window_params = [{transform_indices = @transform_0, window_bounds = array<i64: 4, 16, 16>}, {transform_indices = @transform_1, window_bounds = array<i64: 4, 14, 13>}]} {
    %c0 = arith.constant 0 : index
    %c0_0 = arith.constant 0 : index
    %c0_1 = arith.constant 0 : index
    %0 = vector.load %arg1[%c0, %c0_0, %c0_1] : memref<4x16x16xf32, #tpu.memory_space<vmem>>, vector<4x14x13xf32>
    %c0_2 = arith.constant 0 : index
    %c0_3 = arith.constant 0 : index
    %c0_4 = arith.constant 0 : index
    %1 = vector.load %arg2[%c0_2, %c0_3, %c0_4] : memref<4x14x13xf32, #tpu.memory_space<vmem>>, vector<4x14x13xf32>
    tpu.vector_store %arg2[%c0_2, %c0_3, %c0_4], %0 {strides = array<i32>} : memref<4x14x13xf32, #tpu.memory_space<vmem>>, vector<4x14x13xf32>,
    return
  }
  func.func @transform_0(%arg0: i32) -> (i32, i32, i32) {
    %c0_i32 = arith.constant 0 : i32
    %c0_i32_0 = arith.constant 0 : i32
    %c0_i32_1 = arith.constant 0 : i32
    return %arg0, %c0_i32, %c0_i32_0 : i32, i32, i32
  }
  func.func @transform_1(%arg0: i32) -> (i32, i32, i32) {
    %c0_i32 = arith.constant 0 : i32
    %c0_i32_0 = arith.constant 0 : i32
    %c0_i32_1 = arith.constant 0 : i32
    return %arg0, %c0_i32, %c0_i32_0 : i32, i32, i32
  }
}

</mosaic_0001>

<bundles_post_ra>
// kernel: tpu_custom_call.1
= control target key start
LH: loop header
LB: loop body
LE: loop exit
PB: predicated region body
PF: predicated region fallthrough
CT: control target
= control target key end

     0   :  { %6 = vsyncpa [#allocation3], 0  ;;  %s482_s0 = inlined_call_operand.hbm [shape: f32[8,16,16], index: 0, kind: input, shape index: {}]   ;;  %s483_s1 = inlined_call_operand.vmem [shape: f32[8,14,13], index: 1, kind: output, shape index: {}]  }
   0x1   :  { %8 = vsyncpa [#allocation3 + $0x1], 0  ;;  %s367_s6 = smov 0   ;;  %s369_s7 = smov 0  }
   0x2   :  { %s371_s8 = smov 0   ;;  %s373_s9 = smov 0  }
   0x3 LB: > { %s229_s10 = sadd.s32 4294967295, %s352_s9   ;;  %s387_s11 = sadd.s32 1, %s352_s9   ;;  %s352_s9 = sphi %s373_s9, %s490_s9   ;;  %s348_s8 = sphi %s371_s8, %s489_s8   ;;  %s344_s7 = sphi %s369_s7, %s488_s7   ;;  %s340_s6 = sphi %s367_s6, %s487_s6  }
   0x4   : > { %s18_s12 = ssub.s32 %s352_s9, %s387_s11  ;;  %s21_s13 = sadd.s32 1, %s348_s8 }
   0x5   : > { %p19_p0 = scmp.eq.s32.totalorder %s18_s12, 0  ;;  %p28_p1 = scmp.ne.s32.totalorder %s348_s8, %s344_s7 }
   0x6   : > { %p29_p2 = scmp.eq.s32.totalorder %s352_s9, 0  ;;  %p34_p3 = scmp.ne.s32.totalorder %s344_s7, %s340_s6 }
   0x7   : > { %s397_s14 = scalar_select %p19_p0, %s348_s8, %s21_s13  }
   0x8   : > { %p30_p4 = por %p29_p2, %p28_p1  ;;  %p35_p5 = scmp.eq.s32.totalorder %s229_s10, 0 }
   0x9   : > { %p253_p6 = scmp.lt.s32.totalorder %s352_s9, 2  ;;  %s84_s16 = sand.u32 1, %s348_s8  }
   0xa   : > { %p402_p7 = por %p35_p5, %p34_p3  ;;  %s233_s17 = sshll.u32 %s84_s16, 6 }
   0xb   : > { %s245_s18 = sshll.u32 %s352_s9, 10  ;;  %s88_s22 = scalar_lea.vmem [#allocation2], %s233_s17 }
   0xc   : > { %s411_s21 = scalar_lea.hbm %s482_s0, %s245_s18  ;;  %s96_s23 = sshll.u32 %s88_s22, 4  ;;  %s413_s23 = int_to_ptr.vmem [resolvable:$true] %s96_s23 }
   0xd   : > { %p415_p8 = pnand %p253_p6, %p30_p4  ;;  %s420_s25 = scalar_lea.sflag [#allocation3], %s84_s16 }
   0xe   : > { %s288_s26 = scalar_lea.hbm %s411_s21, 1024  ;;  %s293_s29 = scalar_lea.hbm %s482_s0, 2048 }
   0xf   : > { %p289_p10 = scmp.ne.s32.totalorder %s411_s21, %s288_s26  ;;  %p290_p11 = pneg %p415_p8 }
  0x10   : > { %p294_p0 = scmp.lt.u32.totalorder %s411_s21, %s482_s0  ;;  %p295_p1 = scmp.lt.u32.totalorder %s293_s29, %s288_s26 }
  0x11   : > { %p291_p12 = pnand %p290_p11, %p289_p10  ;;  %p297_p3 = scmp.lt.u32.totalorder %s288_s26, %s411_s21 }
  0x12   : > { %p296_p2 = por %p295_p1, %p294_p0 }
  0x13   : > { %p292_p13 = pneg %p291_p12 }
  0x14   : > { %p298_p4 = por %p297_p3, %p296_p2 }
  0x16   : > { %p299_p5 = pnand %p298_p4, %p292_p13 }
  0x18   : > { %302 = shalt.err (!%p299_p5)
}
  0x19   : > { %s303_s3 = scalar_lea.vmem %s413_s23, 1024  ;;  %s354_s4 = smov [#allocation2]  }
  0x1a   : > { %p304_p6 = scmp.ne.s32.totalorder %s413_s23, %s303_s3  ;;  %s308_s5 = sshll.u32 %s354_s4, 4  ;;  %s309_s5 = int_to_ptr.vmem [resolvable:$false] %s308_s5 }
  0x1b   : > { %s310_s6 = scalar_lea.vmem %s309_s5, 2048  ;;  %p311_p9 = scmp.lt.s32.totalorder %s413_s23, %s309_s5 }
  0x1c   : > { %p306_p10 = pnand %p304_p6, %p290_p11  ;;  %p312_p0 = scmp.lt.s32.totalorder %s310_s6, %s303_s3 }
  0x1e   : > { %p307_p12 = pneg %p306_p10  ;;  %p313_p1 = por %p312_p0, %p311_p9 }
  0x20   : > { %p314_p2 = pnand %p313_p1, %p307_p12 }
  0x22   : > { %317 = shalt.err (!%p314_p2)
}
  0x23   : > { %s355_s12 = smov 128   ;;  %s356_s13 = smov 8  }
  0x24   : > { %252 = dma.hbm_to_vmem [thread:$0]  (!%p415_p8), %s411_s21, 1024, %s413_s23, %s420_s25, %s355_s12, %s355_s12, %s356_s13  }
  0x25   : > { %p104_p11 = scmp.lt.s32.totalorder %s352_s9, 3  ;;  %p486_p13 = scmp.ge.s32.totalorder %s352_s9, 1 }
  0x27   : > { %p105_p3 = pnand %p486_p13, %p104_p11 }
  0x28   : > { %s110_s16 = sand.u32 (!%p105_p3), 1, %s344_s7  }
  0x29   : > { %108 = sbr.rel (%p105_p3) target bundleno = 59 (0x3b), region = 24  ;;  %s238_s17 = sshll.u32 (!%p105_p3), %s110_s16, 6 }
  0x2a   : > { %s111_s18 = scalar_lea.sflag (!%p105_p3), [#allocation3], %s110_s16  ;;  %s114_s19 = scalar_lea.vmem (!%p105_p3), [#allocation2], %s238_s17 }
  0x30   : > { %335 = dma.done.wait (%p402_p7), %s111_s18, 1024  }
  0x31   : > { %337 = vsyncadd (%p402_p7), %s111_s18, 4294966272  ;;  %s239_s20 = sshll.u32 %s229_s10, 2  ;;  %vm150_vm0 = vcmask 105472   ;;  %vm152_vm1 = vcmask 103424   ;;  %v142_v0 = vld [vmem:[%s114_s19] sm:$0xff]  ;;  %v144_v2 = vld [vmem:[%s114_s19 + $0x10] sm:$0xff] }
  0x32   : > { %p136_p9 = scmp.lt.s32.totalorder %s239_s20, 7  ;;  %v143_v1 = vld [vmem:[%s114_s19 + $0x8] sm:$0x3f]  ;;  %v145_v3 = vld [vmem:[%s114_s19 + $0x18] sm:$0x3f]  ;;  %v146_v4 = vld [vmem:[%s114_s19 + $0x20] sm:$0xff] }
  0x33   : > { %v147_v5 = vld [vmem:[%s114_s19 + $0x28] sm:$0x3f]  ;;  %v148_v6 = vld [vmem:[%s114_s19 + $0x30] sm:$0xff]  ;;  %v149_v7 = vld [vmem:[%s114_s19 + $0x38] sm:$0x3f] }
  0x34   : > { %s492_s20 = smov (!%p136_p9, %s239_s20), 7 }
  0x35   : > { %s246_s21 = sshll.u32 %s492_s20, 4 }
  0x36   : > { %s140_s24 = scalar_lea.vmem %s483_s1, %s246_s21 }
  0x37   : > { %151 = vst.msk [vmem:[%s140_s24] sm:$0xff] %vm150_vm0, %v142_v0  ;;  %154 = vst.msk [vmem:[%s140_s24 + $0x10] sm:$0xff] %vm150_vm0, %v144_v2 }
  0x38   : > { %153 = vst.msk [vmem:[%s140_s24 + $0x8] sm:$0x3f] %vm152_vm1, %v143_v1  ;;  %155 = vst.msk [vmem:[%s140_s24 + $0x18] sm:$0x3f] %vm152_vm1, %v145_v3 }
  0x39   : > { %156 = vst.msk [vmem:[%s140_s24 + $0x20] sm:$0xff] %vm150_vm0, %v146_v4  ;;  %158 = vst.msk [vmem:[%s140_s24 + $0x30] sm:$0xff] %vm150_vm0, %v148_v6 }
  0x3a   : > { %157 = vst.msk [vmem:[%s140_s24 + $0x28] sm:$0x3f] %vm152_vm1, %v147_v5  ;;  %159 = vst.msk [vmem:[%s140_s24 + $0x38] sm:$0x3f] %vm152_vm1, %v149_v7 }
  0x3b PF: > { %p11_p7 = scmp.ge.s32.totalorder %s387_s11, 4   ;;  %s487_s6 = smov %s344_s7 }
  0x3c   : > { %s488_s7 = smov %s348_s8  ;;  %s489_s8 = smov %s397_s14 }
  0x3d   : > { %s490_s9 = smov %s387_s11  ;;  %13 = sbr.rel (!%p11_p7) target bundleno = 3 (0x3), region = 64 }
  0x44   :  { %184 = vsyncpa [#allocation3], 1 }
  0x45   :  { %186 = vsyncpa [#allocation3 + $0x1], 1 }

</bundles_post_ra>
